<compile_context>
chip_gen: v6e
topology: v6e:2x2x1
jax: 0.10.0
libtpu: 0.0.40
codegen_flags: <defaults>
</compile_context>

<pallas_src>
import functools

import jax
import jax.numpy as jnp
from jax.experimental import pallas as pl
from jax.experimental.pallas import tpu as pltpu

LOG_STD_MAX = 2.0
LOG_STD_MIN = -5.0
HIDDEN = 256
LANE = 128
SUBLANE = 8
TB_MAX = 1024   # max batch-tile rows; ~few MiB working set at this size


def _round_up(x, m):
    return (x + m - 1) // m * m


def actor_kernel(x_ref, w1_ref, w2_ref, wh_ref, b_ref, out_ref, *, half):
    """Fused 3-layer MLP with both heads in ONE lane-dense output block:
       lanes [0, half) = mean, lanes [half, 2*half) = squashed log_std."""
    x = x_ref[...]                                   # (TB, obs_dim)  bf16
    b_all = b_ref[...]                               # (3, max(HIDDEN, 2*half)) f32
    b1 = b_all[0:1, :HIDDEN]
    b2 = b_all[1:2, :HIDDEN]
    bh = b_all[2:3, :2 * half]

    # fc1 + relu (bf16 operands, f32 accumulation)
    h1 = jnp.dot(x, w1_ref[...], preferred_element_type=jnp.float32) + b1
    h1 = jnp.maximum(h1, 0.0)

    # fc2 + relu
    h2 = jnp.dot(h1.astype(w2_ref.dtype), w2_ref[...],
                 preferred_element_type=jnp.float32) + b2
    h2 = jnp.maximum(h2, 0.0)

    # fused heads: single (HIDDEN, 2*half) matmul -> [mean | raw log_std]
    heads = jnp.dot(h2.astype(wh_ref.dtype), wh_ref[...],
                    preferred_element_type=jnp.float32) + bh

    # tanh + affine squash only on the log_std lanes (lane index >= half)
    lane = jax.lax.broadcasted_iota(jnp.int32, heads.shape, dimension=1)
    log_std = LOG_STD_MIN + 0.5 * (LOG_STD_MAX - LOG_STD_MIN) * (jnp.tanh(heads) + 1.0)
    out_ref[...] = jnp.where(lane >= half, log_std, heads)


def pack_params(p, act_dim, param_dtype=jnp.bfloat16):
    """One-time offline packing: fuse both head weights into one lane-dense block,
    consolidate all biases into one (3, width) operand, cast matmul weights to bf16."""
    # `half` = lane offset of the log_std head inside the single packed output.
    half = LANE // 2 if act_dim <= LANE // 2 else _round_up(act_dim, LANE)
    head_w = 2 * half

    wh = jnp.zeros((HIDDEN, head_w), jnp.float32)
    wh = wh.at[:, :act_dim].set(p["wm"])
    wh = wh.at[:, half:half + act_dim].set(p["ws"])

    bw = max(HIDDEN, head_w)
    b = jnp.zeros((3, bw), jnp.float32)
    b = b.at[0, :HIDDEN].set(p["b1"][0])
    b = b.at[1, :HIDDEN].set(p["b2"][0])
    b = b.at[2, :act_dim].set(p["bm"][0])
    b = b.at[2, half:half + act_dim].set(p["bs"][0])

    return dict(
        w1=p["w1"].astype(param_dtype),
        w2=p["w2"].astype(param_dtype),
        wh=wh.astype(param_dtype),
        b=b,                             # biases stay f32 (added after f32 accumulation)
        half=half, act_dim=act_dim, param_dtype=param_dtype,
    )


def _choose_tile(batch):
    """Adaptive batch tile: big tiles to amortize per-grid-step overhead, sized to
    minimize padding, and >=2 grid steps for large batches (both v7x TensorCores)."""
    n = max(1, pl.cdiv(batch, TB_MAX))
    if batch >= 2 * LANE:
        n = max(n, 2)
    return _round_up(pl.cdiv(batch, n), SUBLANE)


def actor_forward(x, packed, *, tb=None):
    """Actor forward pass via one batch-tiled Pallas kernel. Returns (mean, log_std)."""
    batch, obs_dim = x.shape
    half = packed["half"]
    act_dim = packed["act_dim"]
    head_w = 2 * half

    if tb is None:
        tb = _choose_tile(batch)
    b_pad = _round_up(batch, tb)

    xk = x.astype(packed["param_dtype"])
    if b_pad != batch:
        xk = jnp.pad(xk, ((0, b_pad - batch), (0, 0)))
    grid = (b_pad // tb,)

    kernel = functools.partial(actor_kernel, half=half)

    out = pl.pallas_call(
        kernel,
        out_shape=jax.ShapeDtypeStruct((b_pad, head_w), jnp.float32),
        grid=grid,
        in_specs=[
            pl.BlockSpec((tb, obs_dim), lambda i: (i, 0)),           # x: tiled over batch (obs_dim intentionally unpadded)
            pl.BlockSpec((obs_dim, HIDDEN), lambda i: (0, 0)),       # W1: VMEM-resident
            pl.BlockSpec((HIDDEN, HIDDEN), lambda i: (0, 0)),        # W2: VMEM-resident
            pl.BlockSpec((HIDDEN, head_w), lambda i: (0, 0)),        # fused head W: VMEM-resident
            pl.BlockSpec(packed["b"].shape, lambda i: (0, 0)),       # packed biases: VMEM-resident
        ],
        out_specs=pl.BlockSpec((tb, head_w), lambda i: (i, 0)),      # single lane-dense output
        compiler_params=pltpu.CompilerParams(
            dimension_semantics=("parallel",),
        ),
    )(xk, packed["w1"], packed["w2"], packed["wh"], packed["b"])

    mean = out[:batch, :act_dim]
    log_std = out[:batch, half:half + act_dim]
    return mean, log_std


def init_params(key, obs_dim, act_dim):
    """Deterministic synthetic parameter init (shapes match the PyTorch module)."""
    ks = jax.random.split(key, 8)

    def lin(kw, kb, fan_in, fan_out):
        bound = 1.0 / jnp.sqrt(fan_in)
        w = jax.random.uniform(kw, (fan_in, fan_out), jnp.float32, -bound, bound)
        b = jax.random.uniform(kb, (1, fan_out), jnp.float32, -bound, bound)
        return w, b

    w1, b1 = lin(ks[0], ks[1], obs_dim, HIDDEN)
    w2, b2 = lin(ks[2], ks[3], HIDDEN, HIDDEN)
    wm, bm = lin(ks[4], ks[5], HIDDEN, act_dim)
    ws, bs = lin(ks[6], ks[7], HIDDEN, act_dim)
    return dict(w1=w1, b1=b1, w2=w2, b2=b2, wm=wm, bm=bm, ws=ws, bs=bs)


def actor_forward_ref(x, p):
    """Pure-JAX f32 reference of the PyTorch forward."""
    h1 = jnp.maximum(x @ p["w1"] + p["b1"], 0.0)
    h2 = jnp.maximum(h1 @ p["w2"] + p["b2"], 0.0)
    mean = h2 @ p["wm"] + p["bm"]
    log_std = jnp.tanh(h2 @ p["ws"] + p["bs"])
    log_std = LOG_STD_MIN + 0.5 * (LOG_STD_MAX - LOG_STD_MIN) * (log_std + 1.0)
    return mean, log_std


if __name__ == "__main__":
    key = jax.random.PRNGKey(0)
    k_x, k_p, k_x2 = jax.random.split(key, 3)

    obs_dim, act_dim = 16, 8   # small MuJoCo-like shapes
    params = init_params(k_p, obs_dim, act_dim)
    packed = pack_params(params, act_dim)

    # bf16 operands with f32 accumulation -> compare against f32 ref with loose tolerance.
    TOL = dict(atol=5e-2, rtol=5e-2)

    # Small batch (single grid step).
    x = jax.random.normal(k_x, (8, obs_dim), jnp.float32)
    mean, log_std = actor_forward(x, packed)
    jax.block_until_ready((mean, log_std))
    mean_ref, log_std_ref = actor_forward_ref(x, params)
    assert mean.shape == (8, act_dim) and log_std.shape == (8, act_dim)
    assert jnp.allclose(mean, mean_ref, **TOL)
    assert jnp.allclose(log_std, log_std_ref, **TOL)

    # Larger, non-multiple batch: exercises adaptive tile (2 grid steps, minimal padding).
    x2 = jax.random.normal(k_x2, (520, obs_dim), jnp.float32)
    mean2, log_std2 = actor_forward(x2, packed)
    jax.block_until_ready((mean2, log_std2))
    mean2_ref, log_std2_ref = actor_forward_ref(x2, params)
    assert mean2.shape == (520, act_dim) and log_std2.shape == (520, act_dim)
    assert jnp.allclose(mean2, mean2_ref, **TOL)
    assert jnp.allclose(log_std2, log_std2_ref, **TOL)

    # TODO(synk): get_action() (Normal rsample, tanh-squash log-prob, action_scale/bias)
    # is host-side sampling logic and is not part of the translated forward kernel.
    print("KERNEL_OK")
</pallas_src>

<mosaic_0001>
module attributes {stable_mosaic.version = 11 : i64} {
  func.func @actor_kernel(%arg0: i32, %arg1: memref<8x16xbf16, #tpu.memory_space<vmem>>, %arg2: memref<16x256xbf16, #tpu.memory_space<vmem>>, %arg3: memref<256x256xbf16, #tpu.memory_space<vmem>>, %arg4: memref<256x128xbf16, #tpu.memory_space<vmem>>, %arg5: memref<3x256xf32, #tpu.memory_space<vmem>>, %arg6: memref<8x128xf32, #tpu.memory_space<vmem>>) attributes {dimension_semantics = [#tpu.dimension_semantics<parallel>], iteration_bounds = array<i64: 1>, scalar_prefetch = 0 : i64, scratch_operands = 0 : i64, tpu.core_type = #tpu.core_type<tc>, window_params = [{transform_indices = @transform_0, window_bounds = array<i64: 8, 16>}, {pipeline_mode = #tpu.pipeline_mode<synchronous>, transform_indices = @transform_1, window_bounds = array<i64: 16, 256>}, {pipeline_mode = #tpu.pipeline_mode<synchronous>, transform_indices = @transform_2, window_bounds = array<i64: 256, 256>}, {pipeline_mode = #tpu.pipeline_mode<synchronous>, transform_indices = @transform_3, window_bounds = array<i64: 256, 128>}, {pipeline_mode = #tpu.pipeline_mode<synchronous>, transform_indices = @transform_4, window_bounds = array<i64: 3, 256>}, {transform_indices = @transform_5, window_bounds = array<i64: 8, 128>}]} {
    %c0 = arith.constant 0 : index
    %c0_0 = arith.constant 0 : index
    %0 = vector.load %arg1[%c0, %c0_0] : memref<8x16xbf16, #tpu.memory_space<vmem>>, vector<8x16xbf16>
    %c0_1 = arith.constant 0 : index
    %c0_2 = arith.constant 0 : index
    %1 = vector.load %arg5[%c0_1, %c0_2] : memref<3x256xf32, #tpu.memory_space<vmem>>, vector<3x256xf32>
    %2 = vector.extract_strided_slice %1 {offsets = [0, 0], sizes = [1, 256], strides = [1, 1]} : vector<3x256xf32> to vector<1x256xf32>
    %3 = vector.extract_strided_slice %1 {offsets = [1, 0], sizes = [1, 256], strides = [1, 1]} : vector<3x256xf32> to vector<1x256xf32>
    %4 = vector.extract_strided_slice %1 {offsets = [2, 0], sizes = [1, 128], strides = [1, 1]} : vector<3x256xf32> to vector<1x128xf32>
    %c0_3 = arith.constant 0 : index
    %c0_4 = arith.constant 0 : index
    %5 = vector.load %arg2[%c0_3, %c0_4] : memref<16x256xbf16, #tpu.memory_space<vmem>>, vector<16x256xbf16>
    %cst = arith.constant dense<0.000000e+00> : vector<8x256xf32>
    %6 = tpu.matmul %0, %5, %cst {dimension_numbers = #tpu.dot_dimension_numbers<[1], [0], [0], [1], [0, 0, 1, 1], [], []>} : vector<8x16xbf16>, vector<16x256xbf16>, vector<8x256xf32> -> vector<8x256xf32>
    %7 = vector.broadcast %2 : vector<1x256xf32> to vector<8x256xf32>
    %8 = arith.addf %6, %7 : vector<8x256xf32>
    %cst_5 = arith.constant 0.000000e+00 : f32
    %9 = vector.broadcast %cst_5 : f32 to vector<8x256xf32>
    %10 = arith.maximumf %8, %9 : vector<8x256xf32>
    %11 = arith.truncf %10 : vector<8x256xf32> to vector<8x256xbf16>
    %c0_6 = arith.constant 0 : index
    %c0_7 = arith.constant 0 : index
    %12 = vector.load %arg3[%c0_6, %c0_7] : memref<256x256xbf16, #tpu.memory_space<vmem>>, vector<256x256xbf16>
    %cst_8 = arith.constant dense<0.000000e+00> : vector<8x256xf32>
    %13 = tpu.matmul %11, %12, %cst_8 {dimension_numbers = #tpu.dot_dimension_numbers<[1], [0], [0], [1], [0, 0, 1, 1], [], []>} : vector<8x256xbf16>, vector<256x256xbf16>, vector<8x256xf32> -> vector<8x256xf32>
    %14 = vector.broadcast %3 : vector<1x256xf32> to vector<8x256xf32>
    %15 = arith.addf %13, %14 : vector<8x256xf32>
    %cst_9 = arith.constant 0.000000e+00 : f32
    %16 = vector.broadcast %cst_9 : f32 to vector<8x256xf32>
    %17 = arith.maximumf %15, %16 : vector<8x256xf32>
    %18 = arith.truncf %17 : vector<8x256xf32> to vector<8x256xbf16>
    %c0_10 = arith.constant 0 : index
    %c0_11 = arith.constant 0 : index
    %19 = vector.load %arg4[%c0_10, %c0_11] : memref<256x128xbf16, #tpu.memory_space<vmem>>, vector<256x128xbf16>
    %cst_12 = arith.constant dense<0.000000e+00> : vector<8x128xf32>
    %20 = tpu.matmul %18, %19, %cst_12 {dimension_numbers = #tpu.dot_dimension_numbers<[1], [0], [0], [1], [0, 0, 1, 1], [], []>} : vector<8x256xbf16>, vector<256x128xbf16>, vector<8x128xf32> -> vector<8x128xf32>
    %21 = vector.broadcast %4 : vector<1x128xf32> to vector<8x128xf32>
    %22 = arith.addf %20, %21 : vector<8x128xf32>
    %23 = tpu.iota {dimensions = array<i32: 1>} : vector<8x128xi32>
    %24 = math.tanh %22 : vector<8x128xf32>
    %cst_13 = arith.constant 1.000000e+00 : f32
    %25 = vector.broadcast %cst_13 : f32 to vector<8x128xf32>
    %26 = arith.addf %24, %25 : vector<8x128xf32>
    %cst_14 = arith.constant 3.500000e+00 : f32
    %27 = vector.broadcast %cst_14 : f32 to vector<8x128xf32>
    %28 = arith.mulf %27, %26 : vector<8x128xf32>
    %cst_15 = arith.constant -5.000000e+00 : f32
    %29 = vector.broadcast %cst_15 : f32 to vector<8x128xf32>
    %30 = arith.addf %29, %28 : vector<8x128xf32>
    %c64_i32 = arith.constant 64 : i32
    %31 = vector.broadcast %c64_i32 : i32 to vector<8x128xi32>
    %32 = arith.cmpi sge, %23, %31 : vector<8x128xi32>
    %33 = arith.select %32, %30, %22 : vector<8x128xi1>, vector<8x128xf32>
    %c0_16 = arith.constant 0 : index
    %c0_17 = arith.constant 0 : index
    %34 = vector.load %arg6[%c0_16, %c0_17] : memref<8x128xf32, #tpu.memory_space<vmem>>, vector<8x128xf32>
    tpu.vector_store %arg6[%c0_16, %c0_17], %33 {strides = array<i32>} : memref<8x128xf32, #tpu.memory_space<vmem>>, vector<8x128xf32>,
    return
  }
  func.func @transform_0(%arg0: i32) -> (i32, i32) {
    %c0_i32 = arith.constant 0 : i32
    %c0_i32_0 = arith.constant 0 : i32
    return %arg0, %c0_i32 : i32, i32
  }
  func.func @transform_1(%arg0: i32) -> (i32, i32) {
    %c0_i32 = arith.constant 0 : i32
    %c0_i32_0 = arith.constant 0 : i32
    %c0_i32_1 = arith.constant 0 : i32
    return %c0_i32, %c0_i32_0 : i32, i32
  }
  func.func @transform_2(%arg0: i32) -> (i32, i32) {
    %c0_i32 = arith.constant 0 : i32
    %c0_i32_0 = arith.constant 0 : i32
    %c0_i32_1 = arith.constant 0 : i32
    return %c0_i32, %c0_i32_0 : i32, i32
  }
  func.func @transform_3(%arg0: i32) -> (i32, i32) {
    %c0_i32 = arith.constant 0 : i32
    %c0_i32_0 = arith.constant 0 : i32
    %c0_i32_1 = arith.constant 0 : i32
    return %c0_i32, %c0_i32_0 : i32, i32
  }
  func.func @transform_4(%arg0: i32) -> (i32, i32) {
    %c0_i32 = arith.constant 0 : i32
    %c0_i32_0 = arith.constant 0 : i32
    %c0_i32_1 = arith.constant 0 : i32
    return %c0_i32, %c0_i32_0 : i32, i32
  }
  func.func @transform_5(%arg0: i32) -> (i32, i32) {
    %c0_i32 = arith.constant 0 : i32
    %c0_i32_0 = arith.constant 0 : i32
    return %arg0, %c0_i32 : i32, i32
  }
}

</mosaic_0001>

<bundles_post_ra>
// kernel: tpu_custom_call.1
= control target key start
LH: loop header
LB: loop body
LE: loop exit
PB: predicated region body
PF: predicated region fallthrough
CT: control target
= control target key end

     0   :  { %10 = vsyncpa [#allocation3], 0  ;;  %s967_s0 = inlined_call_operand.hbm [shape: bf16[8,16], index: 0, kind: input, shape index: {}]   ;;  %s968_s1 = inlined_call_operand.hbm [shape: bf16[16,256], index: 1, kind: input, shape index: {}]   ;;  %s969_s2 = inlined_call_operand.hbm [shape: bf16[256,256], index: 2, kind: input, shape index: {}]   ;;  %s970_s3 = inlined_call_operand.hbm [shape: bf16[256,128], index: 3, kind: input, shape index: {}]   ;;  %s971_s4 = inlined_call_operand.hbm [shape: f32[3,256], index: 4, kind: input, shape index: {}]   ;;  %s972_s5 = inlined_call_operand.hbm [shape: f32[8,128], index: 5, kind: output, shape index: {}]  }
   0x1   :  { %11 = vsyncpa [#allocation6], 0 }
   0x2   :  { %12 = vsyncpa [#allocation9], 0 }
   0x3   :  { %13 = vsyncpa [#allocation4], 0  ;;  %s902_s18 = smov [#allocation5]  }
   0x4   :  { %s29_s19 = sshll.u32 %s902_s18, 4  ;;  %s30_s19 = int_to_ptr.vmem [resolvable:$true] %s29_s19 }
   0x5   :  { %s782_s20 = scalar_lea.vmem %s30_s19, 256  ;;  %p787_p1 = scmp.lt.s32.totalorder %s30_s19, %s30_s19 }
   0x6   :  { %p783_p0 = scmp.ne.s32.totalorder %s30_s19, %s782_s20  ;;  %p788_p2 = scmp.lt.s32.totalorder %s782_s20, %s782_s20 }
   0x8   :  { %p789_p3 = por %p788_p2, %p787_p1 }
   0xa   :  { %p790_p4 = pnand %p789_p3, %p783_p0 }
   0xc   :  { %793 = shalt.err (!%p790_p4)
}
   0xd   :  { %s903_s21 = smov 128   ;;  %s904_s22 = smov 8  }
   0xe   :  { %35 = dma.hbm_to_vmem [thread:$0]  %s968_s1, 256, %s30_s19, [#allocation6], %s903_s21, %s903_s21, %s904_s22  }
   0xf   :  { %s905_s25 = smov [#allocation8]  }
  0x10   :  { %s53_s26 = sshll.u32 %s905_s25, 4  ;;  %s54_s26 = int_to_ptr.vmem [resolvable:$true] %s53_s26 }
  0x11   :  { %s802_s27 = scalar_lea.vmem %s54_s26, 2048  ;;  %p807_p6 = scmp.lt.s32.totalorder %s54_s26, %s54_s26 }
  0x12   :  { %p803_p5 = scmp.ne.s32.totalorder %s54_s26, %s802_s27  ;;  %p808_p7 = scmp.lt.s32.totalorder %s802_s27, %s802_s27 }
  0x14   :  { %p809_p8 = por %p808_p7, %p807_p6 }
  0x16   :  { %p810_p9 = pnand %p809_p8, %p803_p5 }
  0x18   :  { %813 = shalt.err (!%p810_p9)
}
  0x19   :  { %s906_s28 = smov 64   ;;  %s907_s29 = smov 4  }
  0x1a   :  { %59 = dma.hbm_to_vmem [thread:$0]  %s970_s3, 2048, %s54_s26, [#allocation9], %s906_s28, %s906_s28, %s907_s29  }
  0x1b   :  { %s908_s7 = smov [#allocation2]   ;;  %s909_s9 = smov [#allocation7]  }
  0x1c   :  { %s20_s8 = sshll.u32 %s908_s7, 4  ;;  %s41_s1 = sshll.u32 %s909_s9, 4  ;;  %s21_s8 = int_to_ptr.vmem [resolvable:$true] %s20_s8  ;;  %s42_s1 = int_to_ptr.vmem [resolvable:$true] %s41_s1 }
  0x1d   :  { %s822_s10 = scalar_lea.vmem %s21_s8, 64  ;;  %p827_p11 = scmp.lt.s32.totalorder %s21_s8, %s21_s8 }
  0x1e   :  { %p823_p10 = scmp.ne.s32.totalorder %s21_s8, %s822_s10  ;;  %p828_p12 = scmp.lt.s32.totalorder %s822_s10, %s822_s10 }
  0x20   :  { %p829_p13 = por %p828_p12, %p827_p11 }
  0x22   :  { %p830_p0 = pnand %p829_p13, %p823_p10 }
  0x24   :  { %833 = shalt.err (!%p830_p0)
}
  0x25   :  { %23 = dma.hbm_to_vmem [thread:$0]  %s967_s0, 64, %s21_s8, [#allocation3]  }
  0x26   :  { %s842_s13 = scalar_lea.vmem %s42_s1, 4096  ;;  %p847_p2 = scmp.lt.s32.totalorder %s42_s1, %s42_s1 }
  0x27   :  { %p843_p1 = scmp.ne.s32.totalorder %s42_s1, %s842_s13  ;;  %p848_p3 = scmp.lt.s32.totalorder %s842_s13, %s842_s13 }
  0x29   :  { %p849_p4 = por %p848_p3, %p847_p2 }
  0x2b   :  { %p850_p5 = pnand %p849_p4, %p843_p1 }
  0x2d   :  { %853 = shalt.err (!%p850_p5)
}
  0x2e   :  { %47 = dma.hbm_to_vmem [thread:$0]  %s969_s2, 4096, %s42_s1, [#allocation6], %s903_s21, %s903_s21, %s904_s22  }
  0x2f   :  { %s910_s15 = smov [#allocation10]  }
  0x30   :  { %s66_s16 = sshll.u32 %s910_s15, 4  ;;  %s67_s16 = int_to_ptr.vmem [resolvable:$true] %s66_s16 }
  0x31   :  { %s862_s17 = scalar_lea.vmem %s67_s16, 128  ;;  %p867_p7 = scmp.lt.s32.totalorder %s67_s16, %s67_s16 }
  0x32   :  { %p863_p6 = scmp.ne.s32.totalorder %s67_s16, %s862_s17  ;;  %p868_p8 = scmp.lt.s32.totalorder %s862_s17, %s862_s17 }
  0x34   :  { %p869_p9 = por %p868_p8, %p867_p7 }
  0x36   :  { %p870_p10 = pnand %p869_p9, %p863_p6 }
  0x38   :  { %873 = shalt.err (!%p870_p10)
}
  0x39   :  { %69 = dma.hbm_to_vmem [thread:$0]  %s971_s4, 128, %s67_s16, [#allocation9]  }
  0x3a   :  { %894 = dma.done.wait [#allocation3], 64  }
  0x3b   :  { %895 = vsyncadd [#allocation3], 4294967232 }
  0x3c   :  { %896 = dma.done.wait [#allocation6], 4352  }
  0x3d   :  { %897 = vsyncadd [#allocation6], 4294962944 }
  0x3e   :  { %898 = dma.done.wait [#allocation9], 2176  }
  0x3f   :  { %899 = vsyncadd [#allocation9], 4294965120  ;;  %v911_v0 = vmov 0   ;;  %v705_v1 = vld [vmem:[#allocation5 + $0x4] ss:$8 sps:$4 sm:$0xff]   ;;  %vm119_vm0 = vcmask 130048   ;;  %v91_v48 = vlaneseq }
  0x40   :  { %155 = vmatprep.mubr.bf16.mxu0 %v911_v0  ;;  %v707_v2 = vld [vmem:[#allocation5] ss:$8 sps:$4 sm:$0xff]   ;;  %v86_v3 = vld [vmem:[#allocation2] sm:$0xf]  ;;  %137 = vmatprep.subr.bf16.mxu0 %v705_v1  ;;  %v708_v4 = vld [vmem:[#allocation7 + $0x74] ss:$8 sps:$4 sm:$0xff]  }
  0x41   :  { %v710_v5 = vld [vmem:[#allocation7 + $0x70] ss:$8 sps:$4 sm:$0xff]   ;;  %138 = vmatpush1.bf16.msra.mxu0 %v707_v2  ;;  %v711_v6 = vld [vmem:[#allocation7 + $0x64] ss:$8 sps:$4 sm:$0xff]   ;;  %378 = vmatprep.subr.bf16.mxu1 %v708_v4  ;;  %v713_v7 = vld [vmem:[#allocation7 + $0x60] ss:$8 sps:$4 sm:$0xff]  }
  0x42   :  { %379 = vmatpush1.bf16.msra.mxu1 %v710_v5  ;;  %v714_v8 = vld [vmem:[#allocation7 + $0x54] ss:$8 sps:$4 sm:$0xff]   ;;  %v716_v9 = vld [vmem:[#allocation7 + $0x50] ss:$8 sps:$4 sm:$0xff]   ;;  %v717_v10 = vld [vmem:[#allocation7 + $0x44] ss:$8 sps:$4 sm:$0xff]  }
  0x43   :  { %380 = vmatprep.subr.bf16.mxu1 %v711_v6  ;;  %v719_v11 = vld [vmem:[#allocation7 + $0x40] ss:$8 sps:$4 sm:$0xff]   ;;  %v720_v12 = vld [vmem:[#allocation7 + $0x34] ss:$8 sps:$4 sm:$0xff]   ;;  %v722_v13 = vld [vmem:[#allocation7 + $0x30] ss:$8 sps:$4 sm:$0xff]  }
  0x44   :  { %623 = vmatmul.mubr.msk.bf16.vlgmr.msra.gmra.mxu0 %vm119_vm0, %v86_v3  ;;  %v723_v14 = vld [vmem:[#allocation7 + $0x24] ss:$8 sps:$4 sm:$0xff]   ;;  %v725_v15 = vld [vmem:[#allocation7 + $0x20] ss:$8 sps:$4 sm:$0xff]   ;;  %v726_v16 = vld [vmem:[#allocation7 + $0x14] ss:$8 sps:$4 sm:$0xff]  }
  0x45   :  { %v728_v17 = vld [vmem:[#allocation7 + $0x10] ss:$8 sps:$4 sm:$0xff]   ;;  %v729_v18 = vld [vmem:[#allocation7 + $0x4] ss:$8 sps:$4 sm:$0xff]   ;;  %v731_v19 = vld [vmem:[#allocation7] ss:$8 sps:$4 sm:$0xff]  }
  0x46   :  { %381 = vmatpush1.bf16.msra.mxu1 %v713_v7  ;;  %v732_v20 = vld [vmem:[#allocation7 + $0xf4] ss:$8 sps:$4 sm:$0xff]   ;;  %v734_v21 = vld [vmem:[#allocation7 + $0xf0] ss:$8 sps:$4 sm:$0xff]   ;;  %v735_v22 = vld [vmem:[#allocation7 + $0xe4] ss:$8 sps:$4 sm:$0xff]  }
  0x47   :  { %382 = vmatprep.subr.bf16.mxu1 %v714_v8  ;;  %v737_v23 = vld [vmem:[#allocation7 + $0xe0] ss:$8 sps:$4 sm:$0xff]   ;;  %v738_v24 = vld [vmem:[#allocation7 + $0xd4] ss:$8 sps:$4 sm:$0xff]   ;;  %v740_v25 = vld [vmem:[#allocation7 + $0xd0] ss:$8 sps:$4 sm:$0xff]  }
  0x48   :  { %v741_v26 = vld [vmem:[#allocation7 + $0xc4] ss:$8 sps:$4 sm:$0xff]   ;;  %v743_v27 = vld [vmem:[#allocation7 + $0xc0] ss:$8 sps:$4 sm:$0xff]   ;;  %v744_v28 = vld [vmem:[#allocation7 + $0xb4] ss:$8 sps:$4 sm:$0xff]  }
  0x49   :  { %v746_v29 = vld [vmem:[#allocation7 + $0xb0] ss:$8 sps:$4 sm:$0xff]   ;;  %v747_v30 = vld [vmem:[#allocation7 + $0xa4] ss:$8 sps:$4 sm:$0xff]   ;;  %v749_v31 = vld [vmem:[#allocation7 + $0xa0] ss:$8 sps:$4 sm:$0xff]  }
  0x4a   :  { %383 = vmatpush1.bf16.msra.mxu1 %v716_v9  ;;  %v750_v32 = vld [vmem:[#allocation7 + $0x94] ss:$8 sps:$4 sm:$0xff]   ;;  %v752_v33 = vld [vmem:[#allocation7 + $0x90] ss:$8 sps:$4 sm:$0xff]   ;;  %v753_v34 = vld [vmem:[#allocation7 + $0x84] ss:$8 sps:$4 sm:$0xff]  }
  0x4b   :  { %384 = vmatprep.subr.bf16.mxu1 %v717_v10  ;;  %v755_v35 = vld [vmem:[#allocation7 + $0x80] ss:$8 sps:$4 sm:$0xff]   ;;  %v756_v36 = vld [vmem:[#allocation8 + $0x78] sm:$0xff]   ;;  %v758_v38 = vld [vmem:[#allocation8 + $0x70] sm:$0xff]   ;;  %v92_v49 = vshrl.u32 %v91_v48, 7  ;;  %s912_s2 = smov [#allocation11]  }
  0x4c   :  { %v757_v37 = vld [vmem:[#allocation8 + $0x38] sm:$0xff]   ;;  %672 = vmatprep.subr.bf16.mxu0 %v756_v36  ;;  %v759_v39 = vld [vmem:[#allocation8 + $0x30] sm:$0xff]   ;;  %v760_v40 = vld [vmem:[#allocation8 + $0x68] sm:$0xff]   ;;  %s610_s4 = sshll.u32 %s912_s2, 4  ;;  %s611_s4 = int_to_ptr.vmem [resolvable:$true] %s610_s4 }
  0x4d   :  { %673 = vmatpush3.bf16.msra.mxu0 %v757_v37  ;;  %v761_v41 = vld [vmem:[#allocation8 + $0x28] sm:$0xff]   ;;  %v762_v42 = vld [vmem:[#allocation8 + $0x60] sm:$0xff]   ;;  %v764_v44 = vld [vmem:[#allocation8 + $0x58] sm:$0xff]   ;;  %v93_v50 = vsub.s32 0, %v92_v49  ;;  %v97_v52 = vsub.s32 4, %v92_v49  ;;  %v202_v7 = vsub.s32 1, %v92_v49  ;;  %p879_p12 = scmp.lt.s32.totalorder %s611_s4, %s611_s4 }
  0x4e   :  { %385 = vmatpush1.bf16.msra.mxu1 %v719_v11  ;;  %674 = vmatprep.subr.bf16.mxu0 %v758_v38  ;;  %v763_v43 = vld [vmem:[#allocation8 + $0x20] sm:$0xff]   ;;  %v765_v45 = vld [vmem:[#allocation8 + $0x18] sm:$0xff]   ;;  %v766_v46 = vld [vmem:[#allocation8 + $0x50] sm:$0xff]   ;;  %v206_v8 = vsub.s32 5, %v92_v49  ;;  %s874_s19 = scalar_lea.vmem %s611_s4, 128 }
  0x4f   :  { %386 = vmatprep.subr.bf16.mxu1 %v720_v12  ;;  %v767_v47 = vld [vmem:[#allocation8 + $0x10] sm:$0xff]   ;;  %v87_v51 = vld [vmem:[#allocation10] sm:$0x77]  ;;  %v768_v3 = vld [vmem:[#allocation8 + $0x48] sm:$0xff]   ;;  %p875_p11 = scmp.ne.s32.totalorder %s611_s4, %s874_s19  ;;  %p880_p13 = scmp.lt.s32.totalorder %s874_s19, %s874_s19 }
  0x50   :  { %v94_v53 = vrot.slane %v87_v51, %v93_v50  ;;  %v98_v54 = vrot.slane %v87_v51, %v97_v52  ;;  %v769_v4 = vld [vmem:[#allocation8 + $0x8] sm:$0xff]   ;;  %v770_v5 = vld [vmem:[#allocation8 + $0x40] sm:$0xff]   ;;  %v203_v9 = vrot.slane %v87_v51, %v202_v7  ;;  %v207_v10 = vrot.slane %v87_v51, %v206_v8 }
  0x51   :  { %675 = vmatpush3.bf16.msra.mxu0 %v759_v39  ;;  %v771_v6 = vld [vmem:[#allocation8] sm:$0xff]   ;;  %p881_p0 = por %p880_p13, %p879_p12 }
  0x52   :  { %387 = vmatpush1.bf16.msra.mxu1 %v722_v13  ;;  %676 = vmatprep.subr.bf16.mxu0 %v760_v40  ;;  %v104_v55 = vrot.slane %v94_v53, %v93_v50  ;;  %v108_v56 = vrot.slane %v98_v54, %v93_v50  ;;  %v213_v11 = vrot.slane %v203_v9, %v202_v7 }
  0x53   :  { %388 = vmatprep.subr.bf16.mxu1 %v723_v14  ;;  %v217_v12 = vrot.slane %v207_v10, %v202_v7  ;;  %p882_p1 = pnand %p881_p0, %p875_p11 }
  0x55   :  { %677 = vmatpush3.bf16.msra.mxu0 %v761_v41 }
  0x56   :  { %389 = vmatpush1.bf16.msra.mxu1 %v725_v15  ;;  %678 = vmatprep.subr.bf16.mxu0 %v762_v42 }
  0x57   :  { %390 = vmatprep.subr.bf16.mxu1 %v726_v16 }
  0x59   :  { %679 = vmatpush3.bf16.msra.mxu0 %v763_v43 }
  0x5a   :  { %391 = vmatpush1.bf16.msra.mxu1 %v728_v17  ;;  %680 = vmatprep.subr.bf16.mxu0 %v764_v44 }
  0x5b   :  { %392 = vmatprep.subr.bf16.mxu1 %v729_v18 }
  0x5d   :  { %681 = vmatpush3.bf16.msra.mxu0 %v765_v45 }
  0x5e   :  { %393 = vmatpush1.bf16.msra.mxu1 %v731_v19  ;;  %682 = vmatprep.subr.bf16.mxu0 %v766_v46 }
  0x5f   :  { %394 = vmatprep.subr.bf16.mxu1 %v732_v20 }
  0x61   :  { %683 = vmatpush3.bf16.msra.mxu0 %v767_v47 }
  0x62   :  { %395 = vmatpush2.bf16.msra.mxu1 %v734_v21  ;;  %684 = vmatprep.subr.bf16.mxu0 %v768_v3 }
  0x63   :  { %396 = vmatprep.subr.bf16.mxu1 %v735_v22 }
  0x65   :  { %685 = vmatpush3.bf16.msra.mxu0 %v769_v4 }
  0x66   :  { %397 = vmatpush2.bf16.msra.mxu1 %v737_v23  ;;  %686 = vmatprep.subr.bf16.mxu0 %v770_v5  ;;  %v457_v23 = vsub.s32 2, %v92_v49 }
  0x67   :  { %398 = vmatprep.subr.bf16.mxu1 %v738_v24 }
  0x69   :  { %687 = vmatpush3.bf16.msra.mxu0 %v771_v6 }
  0x6a   :  { %399 = vmatpush2.bf16.msra.mxu1 %v740_v25  ;;  %v458_v25 = vrot.slane %v87_v51, %v457_v23 }
  0x6b   :  { %400 = vmatprep.subr.bf16.mxu1 %v741_v26 }
  0x6e   :  { %401 = vmatpush2.bf16.msra.mxu1 %v743_v27 }
  0x6f   :  { %402 = vmatprep.subr.bf16.mxu1 %v744_v28 }
  0x72   :  { %403 = vmatpush2.bf16.msra.mxu1 %v746_v29 }
  0x73   :  { %404 = vmatprep.subr.bf16.mxu1 %v747_v30 }
  0x76   :  { %405 = vmatpush2.bf16.msra.mxu1 %v749_v31 }
  0x77   :  { %406 = vmatprep.subr.bf16.mxu1 %v750_v32  ;;  %v596_v32 = vand.u32 127, %v91_v48 }
  0x79   :  { %vm601_vm1 = vcmp.ge.s32.totalorder %v596_v32, 64 }
  0x7a   :  { %407 = vmatpush2.bf16.msra.mxu1 %v752_v33 }
  0x7b   :  { %408 = vmatprep.subr.bf16.mxu1 %v753_v34 }
  0x7e   :  { %409 = vmatpush2.bf16.msra.mxu1 %v755_v35 }
 0x104   :  { %v157_v57 = vpop.f32.mrf.mxu0 }
 0x105   :  { %v158_v58 = vadd.f32 %v157_v57, %v104_v55 }
 0x106   :  { %v159_v59 = vpop.f32.mrf.mxu0 }
 0x107   :  { %v160_v60 = vadd.f32 %v159_v59, %v108_v56  ;;  %v164_v61 = vmax.f32 %v158_v58, 0.0 }
 0x108   :  { %v161_v62 = vpop.f32.mrf.mxu0 }
 0x109   :  { %v165_v63 = vmax.f32 %v160_v60, 0.0  ;;  %v166_v2 = vpack.c.bf16 %v164_v61, %v164_v61 }
 0x10a   :  { %v162_v0 = vpop.f32.mrf.mxu0 }
 0x10b   :  { %v167_v1 = vpack.c.bf16 %v165_v63, %v165_v63 }
 0x10d   :  { %410 = vmatprep.mubr.bf16.mxu1 %v167_v1 }
 0x10e   :  { %411 = vmatmul.mubr.bf16.vlgmr.msra.gmra.mxu1 %v166_v2 }
 0x1ce   :  { %v412_v13 = vpop.f32.mrf.mxu1 }
 0x1cf   :  { %v413_v14 = vadd.f32 %v412_v13, %v213_v11 }
 0x1d0   :  { %v414_v15 = vpop.f32.mrf.mxu1 }
 0x1d1   :  { %v415_v16 = vadd.f32 %v414_v15, %v217_v12  ;;  %v419_v17 = vmax.f32 %v413_v14, 0.0 }
 0x1d2   :  { %v416_v18 = vpop.f32.mrf.mxu1 }
 0x1d3   :  { %v420_v19 = vmax.f32 %v415_v16, 0.0  ;;  %v421_v22 = vpack.c.bf16 %v419_v17, %v419_v17 }
 0x1d4   :  { %v417_v20 = vpop.f32.mrf.mxu1 }
 0x1d5   :  { %v422_v21 = vpack.c.bf16 %v420_v19, %v420_v19 }
 0x1d7   :  { %587 = vmatprep.mubr.bf16.mxu0 %v422_v21 }
 0x1d8   :  { %588 = vmatmul.mubr.bf16.vlgmr.msra.gmra.mxu0 %v421_v22 }
 0x298   :  { %v688_v24 = vpop.f32.mrf.mxu0 }
 0x29a   :  { %v689_v26 = vpop.f32.mrf.mxu0 }
 0x29b   :  { %v690_v27 = vadd.f32 %v689_v26, %v688_v24 }
 0x29c   :  { %v691_v28 = vpop.f32.mrf.mxu0 }
 0x29d   :  { %v590_v29 = vadd.f32 %v690_v27, %v458_v25 }
 0x29e   :  { %v692_v30 = vpop.f32.mrf.mxu0 }
 0x29f   :  { %772 = vtanh.f32 %v590_v29 }
 0x2ac   :  { %v773_v31 = vpop.eup %772 }
 0x2ad   :  { %v598_v33 = vadd.f32 1.0, %v773_v31 }
 0x2af   :  { %v599_v34 = vmul.f32 3.5, %v598_v33 }
 0x2b1   :  { %v600_v35 = vadd.f32 -5.0, %v599_v34 }
 0x2b3   :  { %v602_v36 = vsel %vm601_vm1, %v600_v35, %v590_v29 }
 0x2b4   :  { %603 = vst [vmem:[#allocation11] sm:$0xff] %v602_v36 }
 0x2b5   :  { %885 = shalt.err (!%p882_p1)
}
 0x2b6   :  { %613 = dma.vmem_to_hbm [thread:$0]  %s611_s4, 128, %s972_s5, [#allocation4]  }
 0x2b7   :  { %900 = dma.done.wait [#allocation4], 128  }
 0x2b8   :  { %901 = vsyncadd [#allocation4], 4294967168 }
 0x2b9   :  { %617 = vsyncpa [#allocation3], 1 }
 0x2ba   :  { %618 = vsyncpa [#allocation6], 1 }
 0x2bb   :  { %619 = vsyncpa [#allocation9], 1 }
 0x2bc   :  { %620 = vsyncpa [#allocation4], 1 }

</bundles_post_ra>
